<compile_context>
chip_gen: v7x
topology: tpu7x:2x2x1
jax: 0.10.0
libtpu: 0.0.40
codegen_flags: <defaults>
</compile_context>

<pallas_src>
import functools

import numpy as np
import jax
import jax.numpy as jnp
from jax.experimental import pallas as pl
from jax.experimental.pallas import tpu as pltpu


# --------------------------------------------------------------------------- #
# Kernel
# --------------------------------------------------------------------------- #
def _dino_loss_kernel(temps_ref, student_ref, teacher_ref, center_ref,
                      loss_ref, tsum_ref, *, teacher_n_crops, student_n_crops):
    """One grid step = one batch tile for all crops, processed crop-by-crop.

    Grid: (cores, tiles_per_core); axis 0 is "parallel" (megacore), axis 1 is
    the batch-tile reduction ("arbitrary").

    temps_ref   : SMEM (2,) f32                [1/student_temp, 1/teacher_temp]
    student_ref : VMEM [T+S, tile_b, D]        (any float dtype; upcast per crop)
    teacher_ref : VMEM [T,   tile_b, D]
    center_ref  : VMEM [1, D]                  (resident across steps)
    loss_ref    : VMEM [1, 1, D] f32           per-core per-lane loss partials
    tsum_ref    : VMEM [1, 1, D] f32           per-core raw-teacher column sums
    """
    T = teacher_n_crops
    S = student_n_crops
    tb = student_ref.shape[1]
    D = student_ref.shape[2]

    @pl.when(pl.program_id(1) == 0)
    def _init():
        loss_ref[...] = jnp.zeros_like(loss_ref)
        tsum_ref[...] = jnp.zeros_like(tsum_ref)

    inv_s_temp = temps_ref[0]
    inv_t_temp = temps_ref[1]
    center = center_ref[...].astype(jnp.float32)                 # [1, D]

    def student_log_softmax(crop):
        z = student_ref[crop].astype(jnp.float32) * inv_s_temp   # [tb, D]
        z = z - jnp.max(z, axis=-1, keepdims=True)
        return z - jnp.log(jnp.sum(jnp.exp(z), axis=-1, keepdims=True))

    zero = jnp.zeros((tb, D), jnp.float32)
    t_total = zero      # sum_j softmax(teacher_j)
    s_total = zero      # sum_i log_softmax(student_i)
    diag = zero         # sum_{j<T} softmax(teacher_j) * log_softmax(student_j)
    traw_total = zero   # sum_j raw teacher_j   (for the center EMA)

    # ---- teacher crops (also cover the matching student crops) ----
    for j in range(T):
        traw = teacher_ref[j].astype(jnp.float32)                # [tb, D]
        z = (traw - center) * inv_t_temp
        z = z - jnp.max(z, axis=-1, keepdims=True)
        e = jnp.exp(z)
        den = jnp.sum(e, axis=-1, keepdims=True)
        tsm = e * pl.reciprocal(den, approx=False)               # exact: rows sum to 1
        sls = student_log_softmax(j)
        t_total = t_total + tsm
        s_total = s_total + sls
        diag = diag + tsm * sls
        traw_total = traw_total + traw

    # ---- remaining student-only crops ----
    for i in range(T, T + S):
        s_total = s_total + student_log_softmax(i)

    # sum_{i != j} (-t[j] * s[i]) = diag - (sum_j t[j]) * (sum_i s[i]) elementwise;
    # fold only the batch rows here (VPU/sublane), keep the lane axis for precision.
    elem = diag - t_total * s_total                              # [tb, D]
    loss_ref[...] += jnp.sum(elem, axis=0, keepdims=True).reshape(1, 1, D)
    tsum_ref[...] += jnp.sum(traw_total, axis=0, keepdims=True).reshape(1, 1, D)


# --------------------------------------------------------------------------- #
# Sizing helpers (generation-aware)
# --------------------------------------------------------------------------- #
def _tpu_vmem_capacity_bytes():
    try:
        return int(pltpu.get_tpu_info().vmem_capacity_bytes)
    except Exception:
        return 64 << 20      # conservative: works on v5e/v6e (128 MiB) and v7x (64 MiB)


def _sublane_rows(min_itemsize):
    # f32 -> 8 rows/sublane-tile, bf16 -> 16, int8/fp8 -> 32.
    return {4: 8, 2: 16, 1: 32}.get(int(min_itemsize), 8)


def _per_row_bytes(T, S, D, s_item, t_item):
    blocks = ((T + S) * s_item + T * t_item) * D * 2   # double-buffered input blocks
    temps = 12 * D * 4                                  # live f32 temporaries (per-crop loop)
    return blocks + temps


def _choose_tile_b(B, T, S, D, s_item, t_item, budget_bytes, sublane):
    """Largest batch tile (multiple of `sublane` dividing B) fitting the budget."""
    per_b = _per_row_bytes(T, S, D, s_item, t_item)
    cands = [b for b in range(sublane, B + 1, sublane) if B % b == 0]
    if not cands:
        cands = [B]
    fitting = [b for b in cands if b * per_b <= budget_bytes]
    if not fitting:
        raise ValueError(
            f"DINOLoss Pallas kernel: no batch tile fits the VMEM budget "
            f"({budget_bytes} bytes) for D={D}, crops=(T={T}, S={S}). "
            "TODO(synk): D-tiled (online-softmax) variant needed for very large D.")
    return max(fitting)


# --------------------------------------------------------------------------- #
# Wrapper
# --------------------------------------------------------------------------- #
def dino_loss_pallas(student_output, teacher_output, center,
                     student_temp, teacher_temp, center_momentum,
                     student_n_crops, teacher_n_crops, tile_b=None):
    """Forward of DINOLoss. student/teacher may be bf16 (preferred) or f32."""
    T, S = teacher_n_crops, student_n_crops
    n_teacher_rows, D = teacher_output.shape
    assert n_teacher_rows % T == 0
    B = n_teacher_rows // T
    assert student_output.shape == ((T + S) * B, D)

    # [crops, B, D] layout -- metadata-only reshape of the leading axis.
    student_r = student_output.reshape(T + S, B, D)
    teacher_r = teacher_output.reshape(T, B, D)

    s_item = student_output.dtype.itemsize
    t_item = teacher_output.dtype.itemsize
    vmem_cap = _tpu_vmem_capacity_bytes()

    if tile_b is None:
        tile_b = _choose_tile_b(
            B, T, S, D, s_item, t_item,
            budget_bytes=int(vmem_cap * 0.55),        # ~70 MiB on 128 MiB parts, ~35 MiB on v7x
            sublane=_sublane_rows(min(s_item, t_item)))
    assert B % tile_b == 0, "tile_b must divide the per-crop batch"
    num_tiles = B // tile_b

    # Leading "parallel" axis: split batch tiles across the (up to) 2 TensorCores.
    num_cores = 2 if (num_tiles % 2 == 0 and num_tiles >= 2) else 1
    tiles_per_core = num_tiles // num_cores

    # Host-side reciprocals (runtime scalars -> no recompile over the temp warmup schedule).
    temps = jnp.asarray([1.0 / float(student_temp), 1.0 / float(teacher_temp)],
                        dtype=jnp.float32)

    kernel = functools.partial(_dino_loss_kernel,
                               teacher_n_crops=T, student_n_crops=S)

    # Scoped-VMEM limit: blocks + temporaries + resident outputs, capped with headroom.
    est = (_per_row_bytes(T, S, D, s_item, t_item) * tile_b
           + 16 * D * 4 + (4 << 20))
    vmem_limit = int(min(max(est, 16 << 20), max(vmem_cap - (12 << 20), 16 << 20)))

    total_elems = student_output.size + teacher_output.size
    cost = pl.CostEstimate(
        flops=int(12 * total_elems),
        transcendentals=int(total_elems),
        bytes_accessed=int(student_output.size * s_item
                           + teacher_output.size * t_item
                           + (1 + 2 * num_cores) * D * 4))

    loss_parts, tsum_parts = pl.pallas_call(
        kernel,
        out_shape=(
            jax.ShapeDtypeStruct((num_cores, 1, D), jnp.float32),   # per-core loss partials
            jax.ShapeDtypeStruct((num_cores, 1, D), jnp.float32),   # per-core teacher col sums
        ),
        grid_spec=pltpu.PrefetchScalarGridSpec(
            num_scalar_prefetch=0,
            grid=(num_cores, tiles_per_core),
            in_specs=[
                pl.BlockSpec(memory_space=pltpu.MemorySpace.SMEM),   # temps
                pl.BlockSpec((T + S, tile_b, D),
                             lambda c, i: (0, c * tiles_per_core + i, 0)),   # student
                pl.BlockSpec((T, tile_b, D),
                             lambda c, i: (0, c * tiles_per_core + i, 0)),   # teacher
                pl.BlockSpec((1, D), lambda c, i: (0, 0)),                   # center (resident)
            ],
            out_specs=(
                pl.BlockSpec((1, 1, D), lambda c, i: (c, 0, 0)),
                pl.BlockSpec((1, 1, D), lambda c, i: (c, 0, 0)),
            ),
        ),
        compiler_params=pltpu.CompilerParams(
            dimension_semantics=("parallel", "arbitrary"),
            vmem_limit_bytes=vmem_limit),
        cost_estimate=cost,
    )(temps, student_r, teacher_r, center)

    # Finalize in the wrapper (tiny): sum the per-core/per-lane partials, normalize, EMA.
    loss = jnp.sum(loss_parts) * jnp.float32(1.0 / (B * S * T))
    # TODO(synk): cross-device all-reduce (psum) of tsum goes here to match
    #             get_dist_env().sync(batch_center); per-device mean for now.
    batch_center = jnp.sum(tsum_parts, axis=0) * jnp.float32(1.0 / (T * B))   # (1, D)
    new_center = (center.astype(jnp.float32) * jnp.float32(center_momentum)
                  + batch_center * jnp.float32(1.0 - center_momentum))
    return loss, new_center


class DINOLoss:
    """JAX/Pallas port of the PyTorch DINOLoss module (forward semantics preserved)."""

    def __init__(self, output_dim, warmup_teacher_temp, warmup_teacher_temp_epochs,
                 teacher_temp, student_temp=0.1, center_momentum=0.9):
        self.student_temp = student_temp
        self.teacher_temp = teacher_temp
        self.center_momentum = center_momentum
        self.center = jnp.zeros((1, output_dim), dtype=jnp.float32)   # buffer, zeros
        self.warmup_teacher_temp_schedule = np.linspace(
            warmup_teacher_temp, teacher_temp, warmup_teacher_temp_epochs)

    def __call__(self, epoch, student_n_crops, teacher_n_crops,
                 student_output, teacher_output, tile_b=None):
        if epoch >= len(self.warmup_teacher_temp_schedule):
            t_temp = self.teacher_temp
        else:
            t_temp = float(self.warmup_teacher_temp_schedule[epoch])
        loss, new_center = dino_loss_pallas(
            student_output, teacher_output, self.center,
            self.student_temp, t_temp, self.center_momentum,
            student_n_crops, teacher_n_crops, tile_b=tile_b)
        self.center = new_center
        return dict(cls_loss=loss)


# --------------------------------------------------------------------------- #
# Pure-JAX reference (mirrors the PyTorch forward) and self-test
# --------------------------------------------------------------------------- #
def _reference(student_output, teacher_output, center,
               student_temp, teacher_temp, center_momentum,
               student_n_crops, teacher_n_crops):
    s_ls = jax.nn.log_softmax(student_output.astype(jnp.float32) / student_temp, axis=-1)
    t_sm = jax.nn.softmax((teacher_output.astype(jnp.float32) - center) / teacher_temp, axis=-1)
    s_chunks = jnp.split(s_ls, teacher_n_crops + student_n_crops, axis=0)
    t_chunks = jnp.split(t_sm, teacher_n_crops, axis=0)
    cls_loss = 0.0
    for i in range(teacher_n_crops + student_n_crops):
        for j in range(teacher_n_crops):
            if i == j:
                continue
            cls_loss += jnp.mean(jnp.sum(-t_chunks[j] * s_chunks[i], axis=-1))
    cls_loss = cls_loss / student_n_crops / teacher_n_crops
    batch_center = jnp.mean(teacher_output.astype(jnp.float32), axis=0, keepdims=True)
    new_center = center * center_momentum + batch_center * (1 - center_momentum)
    return cls_loss, new_center


if __name__ == "__main__":
    # Small deterministic shapes; tile_b=8 -> grid (2, 2) exercising the
    # parallel-core split and the init/accumulate path.
    B = 32                 # per-crop batch size
    D = 256                # output_dim (prototype dim), lane-dense multiple of 128
    teacher_n_crops = 2
    student_n_crops = 4
    epoch = 5

    key = jax.random.PRNGKey(0)
    k1, k2 = jax.random.split(key)
    student_output = jax.random.normal(
        k1, ((teacher_n_crops + student_n_crops) * B, D), dtype=jnp.float32)
    teacher_output = jax.random.normal(
        k2, (teacher_n_crops * B, D), dtype=jnp.float32)

    loss_mod = DINOLoss(output_dim=D, warmup_teacher_temp=0.04,
                        warmup_teacher_temp_epochs=10, teacher_temp=0.07,
                        student_temp=0.1, center_momentum=0.9)
    t_temp = float(loss_mod.warmup_teacher_temp_schedule[epoch])
    center_before = loss_mod.center

    ref_loss, ref_center = _reference(
        student_output, teacher_output, center_before,
        loss_mod.student_temp, t_temp, loss_mod.center_momentum,
        student_n_crops, teacher_n_crops)

    # Run 1: explicit small tile (multi-step reduction + both-core split).
    out = loss_mod(epoch, student_n_crops, teacher_n_crops,
                   student_output, teacher_output, tile_b=8)
    cls_loss = jax.block_until_ready(out["cls_loss"])
    new_center = jax.block_until_ready(loss_mod.center)
    np.testing.assert_allclose(np.asarray(cls_loss), np.asarray(ref_loss),
                               rtol=1e-4, atol=1e-5)
    np.testing.assert_allclose(np.asarray(new_center), np.asarray(ref_center),
                               rtol=1e-5, atol=1e-6)

    # Run 2: auto-chosen tile (generation-aware budget path).
    loss2, center2 = dino_loss_pallas(
        student_output, teacher_output, center_before,
        loss_mod.student_temp, t_temp, loss_mod.center_momentum,
        student_n_crops, teacher_n_crops, tile_b=None)
    loss2 = jax.block_until_ready(loss2)
    center2 = jax.block_until_ready(center2)
    np.testing.assert_allclose(np.asarray(loss2), np.asarray(ref_loss),
                               rtol=1e-4, atol=1e-5)
    np.testing.assert_allclose(np.asarray(center2), np.asarray(ref_center),
                               rtol=1e-5, atol=1e-6)

    print("KERNEL_OK")
</pallas_src>

<mosaic_0001>
module attributes {stable_mosaic.version = 11 : i64} {
  func.func @_dino_loss_kernel(%arg0: i32, %arg1: i32, %arg2: memref<2xf32, #tpu.memory_space<smem>>, %arg3: memref<6x8x256xf32, #tpu.memory_space<vmem>>, %arg4: memref<2x8x256xf32, #tpu.memory_space<vmem>>, %arg5: memref<1x256xf32, #tpu.memory_space<vmem>>, %arg6: memref<1x1x256xf32, #tpu.memory_space<vmem>>, %arg7: memref<1x1x256xf32, #tpu.memory_space<vmem>>) attributes {dimension_semantics = [#tpu.dimension_semantics<parallel>, #tpu.dimension_semantics<arbitrary>], iteration_bounds = array<i64: 2, 2>, scalar_prefetch = 0 : i64, scratch_operands = 0 : i64, tpu.core_type = #tpu.core_type<tc>, window_params = [{transform_indices = @transform_0, window_bounds = array<i64: 2>}, {transform_indices = @transform_1, window_bounds = array<i64: 6, 8, 256>}, {transform_indices = @transform_2, window_bounds = array<i64: 2, 8, 256>}, {pipeline_mode = #tpu.pipeline_mode<synchronous>, transform_indices = @transform_3, window_bounds = array<i64: 1, 256>}, {transform_indices = @transform_4, window_bounds = array<i64: 1, 1, 256>}, {transform_indices = @transform_5, window_bounds = array<i64: 1, 1, 256>}]} {
    %c0_i32 = arith.constant 0 : i32
    %0 = arith.cmpi eq, %arg1, %c0_i32 : i32
    %1 = arith.extui %0 : i1 to i32
    %c0_i32_0 = arith.constant 0 : i32
    %2 = arith.cmpi ne, %1, %c0_i32_0 : i32
    scf.if %2 {
      %cst_53 = arith.constant 0.000000e+00 : f32
      %151 = vector.broadcast %cst_53 : f32 to vector<1x1x256xf32>
      %c0_54 = arith.constant 0 : index
      %c0_55 = arith.constant 0 : index
      %c0_56 = arith.constant 0 : index
      %152 = vector.load %arg6[%c0_54, %c0_55, %c0_56] : memref<1x1x256xf32, #tpu.memory_space<vmem>>, vector<1x1x256xf32>
      tpu.vector_store %arg6[%c0_54, %c0_55, %c0_56], %151 {strides = array<i32>} : memref<1x1x256xf32, #tpu.memory_space<vmem>>, vector<1x1x256xf32>,
      %cst_57 = arith.constant 0.000000e+00 : f32
      %153 = vector.broadcast %cst_57 : f32 to vector<1x1x256xf32>
      %c0_58 = arith.constant 0 : index
      %c0_59 = arith.constant 0 : index
      %c0_60 = arith.constant 0 : index
      %154 = vector.load %arg7[%c0_58, %c0_59, %c0_60] : memref<1x1x256xf32, #tpu.memory_space<vmem>>, vector<1x1x256xf32>
      tpu.vector_store %arg7[%c0_58, %c0_59, %c0_60], %153 {strides = array<i32>} : memref<1x1x256xf32, #tpu.memory_space<vmem>>, vector<1x1x256xf32>,
    } else {
    }
    %c0 = arith.constant 0 : index
    %3 = memref.load %arg2[%c0] : memref<2xf32, #tpu.memory_space<smem>>
    %c1 = arith.constant 1 : index
    %4 = memref.load %arg2[%c1] : memref<2xf32, #tpu.memory_space<smem>>
    %c0_1 = arith.constant 0 : index
    %c0_2 = arith.constant 0 : index
    %5 = vector.load %arg5[%c0_1, %c0_2] : memref<1x256xf32, #tpu.memory_space<vmem>>, vector<1x256xf32>
    %cst = arith.constant 0.000000e+00 : f32
    %6 = vector.broadcast %cst : f32 to vector<8x256xf32>
    %c0_3 = arith.constant 0 : index
    %c0_4 = arith.constant 0 : index
    %c0_5 = arith.constant 0 : index
    %7 = vector.load %arg4[%c0_3, %c0_4, %c0_5] : memref<2x8x256xf32, #tpu.memory_space<vmem>>, vector<1x8x256xf32>
    %8 = vector.shape_cast %7 : vector<1x8x256xf32> to vector<8x256xf32>
    %9 = vector.broadcast %5 : vector<1x256xf32> to vector<8x256xf32>
    %10 = arith.subf %8, %9 : vector<8x256xf32>
    %11 = vector.broadcast %4 : f32 to vector<8x256xf32>
    %12 = arith.mulf %10, %11 : vector<8x256xf32>
    %cst_6 = arith.constant dense<0xFF800000> : vector<8xf32>
    %13 = vector.multi_reduction <maximumf>, %12, %cst_6 [1] : vector<8x256xf32> to vector<8xf32>
    %14 = vector.shape_cast %13 : vector<8xf32> to vector<8x1xf32>
    %15 = vector.broadcast %14 : vector<8x1xf32> to vector<8x256xf32>
    %16 = arith.subf %12, %15 : vector<8x256xf32>
    %17 = math.exp %16 : vector<8x256xf32>
    %cst_7 = arith.constant dense<0.000000e+00> : vector<8xf32>
    %18 = vector.multi_reduction <add>, %17, %cst_7 [1] : vector<8x256xf32> to vector<8xf32>
    %19 = vector.shape_cast %18 : vector<8xf32> to vector<8x1xf32>
    %20 = tpu.reciprocal %19 : vector<8x1xf32> -> vector<8x1xf32>
    %21 = vector.broadcast %20 : vector<8x1xf32> to vector<8x256xf32>
    %22 = arith.mulf %17, %21 : vector<8x256xf32>
    %c0_8 = arith.constant 0 : index
    %c0_9 = arith.constant 0 : index
    %c0_10 = arith.constant 0 : index
    %23 = vector.load %arg3[%c0_8, %c0_9, %c0_10] : memref<6x8x256xf32, #tpu.memory_space<vmem>>, vector<1x8x256xf32>
    %24 = vector.shape_cast %23 : vector<1x8x256xf32> to vector<8x256xf32>
    %25 = vector.broadcast %3 : f32 to vector<8x256xf32>
    %26 = arith.mulf %24, %25 : vector<8x256xf32>
    %cst_11 = arith.constant dense<0xFF800000> : vector<8xf32>
    %27 = vector.multi_reduction <maximumf>, %26, %cst_11 [1] : vector<8x256xf32> to vector<8xf32>
    %28 = vector.shape_cast %27 : vector<8xf32> to vector<8x1xf32>
    %29 = vector.broadcast %28 : vector<8x1xf32> to vector<8x256xf32>
    %30 = arith.subf %26, %29 : vector<8x256xf32>
    %31 = math.exp %30 : vector<8x256xf32>
    %cst_12 = arith.constant dense<0.000000e+00> : vector<8xf32>
    %32 = vector.multi_reduction <add>, %31, %cst_12 [1] : vector<8x256xf32> to vector<8xf32>
    %33 = vector.shape_cast %32 : vector<8xf32> to vector<8x1xf32>
    %34 = math.log %33 : vector<8x1xf32>
    %35 = vector.broadcast %34 : vector<8x1xf32> to vector<8x256xf32>
    %36 = arith.subf %30, %35 : vector<8x256xf32>
    %37 = arith.addf %6, %22 : vector<8x256xf32>
    %38 = arith.addf %6, %36 : vector<8x256xf32>
    %39 = arith.mulf %22, %36 : vector<8x256xf32>
    %40 = arith.addf %6, %39 : vector<8x256xf32>
    %41 = arith.addf %6, %8 : vector<8x256xf32>
    %c1_13 = arith.constant 1 : index
    %c0_14 = arith.constant 0 : index
    %c0_15 = arith.constant 0 : index
    %42 = vector.load %arg4[%c1_13, %c0_14, %c0_15] : memref<2x8x256xf32, #tpu.memory_space<vmem>>, vector<1x8x256xf32>
    %43 = vector.shape_cast %42 : vector<1x8x256xf32> to vector<8x256xf32>
    %44 = vector.broadcast %5 : vector<1x256xf32> to vector<8x256xf32>
    %45 = arith.subf %43, %44 : vector<8x256xf32>
    %46 = vector.broadcast %4 : f32 to vector<8x256xf32>
    %47 = arith.mulf %45, %46 : vector<8x256xf32>
    %cst_16 = arith.constant dense<0xFF800000> : vector<8xf32>
    %48 = vector.multi_reduction <maximumf>, %47, %cst_16 [1] : vector<8x256xf32> to vector<8xf32>
    %49 = vector.shape_cast %48 : vector<8xf32> to vector<8x1xf32>
    %50 = vector.broadcast %49 : vector<8x1xf32> to vector<8x256xf32>
    %51 = arith.subf %47, %50 : vector<8x256xf32>
    %52 = math.exp %51 : vector<8x256xf32>
    %cst_17 = arith.constant dense<0.000000e+00> : vector<8xf32>
    %53 = vector.multi_reduction <add>, %52, %cst_17 [1] : vector<8x256xf32> to vector<8xf32>
    %54 = vector.shape_cast %53 : vector<8xf32> to vector<8x1xf32>
    %55 = tpu.reciprocal %54 : vector<8x1xf32> -> vector<8x1xf32>
    %56 = vector.broadcast %55 : vector<8x1xf32> to vector<8x256xf32>
    %57 = arith.mulf %52, %56 : vector<8x256xf32>
    %c1_18 = arith.constant 1 : index
    %c0_19 = arith.constant 0 : index
    %c0_20 = arith.constant 0 : index
    %58 = vector.load %arg3[%c1_18, %c0_19, %c0_20] : memref<6x8x256xf32, #tpu.memory_space<vmem>>, vector<1x8x256xf32>
    %59 = vector.shape_cast %58 : vector<1x8x256xf32> to vector<8x256xf32>
    %60 = vector.broadcast %3 : f32 to vector<8x256xf32>
    %61 = arith.mulf %59, %60 : vector<8x256xf32>
    %cst_21 = arith.constant dense<0xFF800000> : vector<8xf32>
    %62 = vector.multi_reduction <maximumf>, %61, %cst_21 [1] : vector<8x256xf32> to vector<8xf32>
    %63 = vector.shape_cast %62 : vector<8xf32> to vector<8x1xf32>
    %64 = vector.broadcast %63 : vector<8x1xf32> to vector<8x256xf32>
    %65 = arith.subf %61, %64 : vector<8x256xf32>
    %66 = math.exp %65 : vector<8x256xf32>
    %cst_22 = arith.constant dense<0.000000e+00> : vector<8xf32>
    %67 = vector.multi_reduction <add>, %66, %cst_22 [1] : vector<8x256xf32> to vector<8xf32>
    %68 = vector.shape_cast %67 : vector<8xf32> to vector<8x1xf32>
    %69 = math.log %68 : vector<8x1xf32>
    %70 = vector.broadcast %69 : vector<8x1xf32> to vector<8x256xf32>
    %71 = arith.subf %65, %70 : vector<8x256xf32>
    %72 = arith.addf %37, %57 : vector<8x256xf32>
    %73 = arith.addf %38, %71 : vector<8x256xf32>
    %74 = arith.mulf %57, %71 : vector<8x256xf32>
    %75 = arith.addf %40, %74 : vector<8x256xf32>
    %76 = arith.addf %41, %43 : vector<8x256xf32>
    %c2 = arith.constant 2 : index
    %c0_23 = arith.constant 0 : index
    %c0_24 = arith.constant 0 : index
    %77 = vector.load %arg3[%c2, %c0_23, %c0_24] : memref<6x8x256xf32, #tpu.memory_space<vmem>>, vector<1x8x256xf32>
    %78 = vector.shape_cast %77 : vector<1x8x256xf32> to vector<8x256xf32>
    %79 = vector.broadcast %3 : f32 to vector<8x256xf32>
    %80 = arith.mulf %78, %79 : vector<8x256xf32>
    %cst_25 = arith.constant dense<0xFF800000> : vector<8xf32>
    %81 = vector.multi_reduction <maximumf>, %80, %cst_25 [1] : vector<8x256xf32> to vector<8xf32>
    %82 = vector.shape_cast %81 : vector<8xf32> to vector<8x1xf32>
    %83 = vector.broadcast %82 : vector<8x1xf32> to vector<8x256xf32>
    %84 = arith.subf %80, %83 : vector<8x256xf32>
    %85 = math.exp %84 : vector<8x256xf32>
    %cst_26 = arith.constant dense<0.000000e+00> : vector<8xf32>
    %86 = vector.multi_reduction <add>, %85, %cst_26 [1] : vector<8x256xf32> to vector<8xf32>
    %87 = vector.shape_cast %86 : vector<8xf32> to vector<8x1xf32>
    %88 = math.log %87 : vector<8x1xf32>
    %89 = vector.broadcast %88 : vector<8x1xf32> to vector<8x256xf32>
    %90 = arith.subf %84, %89 : vector<8x256xf32>
    %91 = arith.addf %73, %90 : vector<8x256xf32>
    %c3 = arith.constant 3 : index
    %c0_27 = arith.constant 0 : index
    %c0_28 = arith.constant 0 : index
    %92 = vector.load %arg3[%c3, %c0_27, %c0_28] : memref<6x8x256xf32, #tpu.memory_space<vmem>>, vector<1x8x256xf32>
    %93 = vector.shape_cast %92 : vector<1x8x256xf32> to vector<8x256xf32>
    %94 = vector.broadcast %3 : f32 to vector<8x256xf32>
    %95 = arith.mulf %93, %94 : vector<8x256xf32>
    %cst_29 = arith.constant dense<0xFF800000> : vector<8xf32>
    %96 = vector.multi_reduction <maximumf>, %95, %cst_29 [1] : vector<8x256xf32> to vector<8xf32>
    %97 = vector.shape_cast %96 : vector<8xf32> to vector<8x1xf32>
    %98 = vector.broadcast %97 : vector<8x1xf32> to vector<8x256xf32>
    %99 = arith.subf %95, %98 : vector<8x256xf32>
    %100 = math.exp %99 : vector<8x256xf32>
    %cst_30 = arith.constant dense<0.000000e+00> : vector<8xf32>
    %101 = vector.multi_reduction <add>, %100, %cst_30 [1] : vector<8x256xf32> to vector<8xf32>
    %102 = vector.shape_cast %101 : vector<8xf32> to vector<8x1xf32>
    %103 = math.log %102 : vector<8x1xf32>
    %104 = vector.broadcast %103 : vector<8x1xf32> to vector<8x256xf32>
    %105 = arith.subf %99, %104 : vector<8x256xf32>
    %106 = arith.addf %91, %105 : vector<8x256xf32>
    %c4 = arith.constant 4 : index
    %c0_31 = arith.constant 0 : index
    %c0_32 = arith.constant 0 : index
    %107 = vector.load %arg3[%c4, %c0_31, %c0_32] : memref<6x8x256xf32, #tpu.memory_space<vmem>>, vector<1x8x256xf32>
    %108 = vector.shape_cast %107 : vector<1x8x256xf32> to vector<8x256xf32>
    %109 = vector.broadcast %3 : f32 to vector<8x256xf32>
    %110 = arith.mulf %108, %109 : vector<8x256xf32>
    %cst_33 = arith.constant dense<0xFF800000> : vector<8xf32>
    %111 = vector.multi_reduction <maximumf>, %110, %cst_33 [1] : vector<8x256xf32> to vector<8xf32>
    %112 = vector.shape_cast %111 : vector<8xf32> to vector<8x1xf32>
    %113 = vector.broadcast %112 : vector<8x1xf32> to vector<8x256xf32>
    %114 = arith.subf %110, %113 : vector<8x256xf32>
    %115 = math.exp %114 : vector<8x256xf32>
    %cst_34 = arith.constant dense<0.000000e+00> : vector<8xf32>
    %116 = vector.multi_reduction <add>, %115, %cst_34 [1] : vector<8x256xf32> to vector<8xf32>
    %117 = vector.shape_cast %116 : vector<8xf32> to vector<8x1xf32>
    %118 = math.log %117 : vector<8x1xf32>
    %119 = vector.broadcast %118 : vector<8x1xf32> to vector<8x256xf32>
    %120 = arith.subf %114, %119 : vector<8x256xf32>
    %121 = arith.addf %106, %120 : vector<8x256xf32>
    %c5 = arith.constant 5 : index
    %c0_35 = arith.constant 0 : index
    %c0_36 = arith.constant 0 : index
    %122 = vector.load %arg3[%c5, %c0_35, %c0_36] : memref<6x8x256xf32, #tpu.memory_space<vmem>>, vector<1x8x256xf32>
    %123 = vector.shape_cast %122 : vector<1x8x256xf32> to vector<8x256xf32>
    %124 = vector.broadcast %3 : f32 to vector<8x256xf32>
    %125 = arith.mulf %123, %124 : vector<8x256xf32>
    %cst_37 = arith.constant dense<0xFF800000> : vector<8xf32>
    %126 = vector.multi_reduction <maximumf>, %125, %cst_37 [1] : vector<8x256xf32> to vector<8xf32>
    %127 = vector.shape_cast %126 : vector<8xf32> to vector<8x1xf32>
    %128 = vector.broadcast %127 : vector<8x1xf32> to vector<8x256xf32>
    %129 = arith.subf %125, %128 : vector<8x256xf32>
    %130 = math.exp %129 : vector<8x256xf32>
    %cst_38 = arith.constant dense<0.000000e+00> : vector<8xf32>
    %131 = vector.multi_reduction <add>, %130, %cst_38 [1] : vector<8x256xf32> to vector<8xf32>
    %132 = vector.shape_cast %131 : vector<8xf32> to vector<8x1xf32>
    %133 = math.log %132 : vector<8x1xf32>
    %134 = vector.broadcast %133 : vector<8x1xf32> to vector<8x256xf32>
    %135 = arith.subf %129, %134 : vector<8x256xf32>
    %136 = arith.addf %121, %135 : vector<8x256xf32>
    %137 = arith.mulf %72, %136 : vector<8x256xf32>
    %138 = arith.subf %75, %137 : vector<8x256xf32>
    %c0_39 = arith.constant 0 : index
    %c0_40 = arith.constant 0 : index
    %c0_41 = arith.constant 0 : index
    %139 = vector.load %arg6[%c0_39, %c0_40, %c0_41] : memref<1x1x256xf32, #tpu.memory_space<vmem>>, vector<1x1x256xf32>
    %cst_42 = arith.constant dense<0.000000e+00> : vector<256xf32>
    %140 = vector.multi_reduction <add>, %138, %cst_42 [0] : vector<8x256xf32> to vector<256xf32>
    %141 = vector.shape_cast %140 : vector<256xf32> to vector<1x256xf32>
    %142 = vector.shape_cast %141 : vector<1x256xf32> to vector<1x1x256xf32>
    %143 = arith.addf %139, %142 : vector<1x1x256xf32>
    %c0_43 = arith.constant 0 : index
    %c0_44 = arith.constant 0 : index
    %c0_45 = arith.constant 0 : index
    %144 = vector.load %arg6[%c0_43, %c0_44, %c0_45] : memref<1x1x256xf32, #tpu.memory_space<vmem>>, vector<1x1x256xf32>
    tpu.vector_store %arg6[%c0_43, %c0_44, %c0_45], %143 {strides = array<i32>} : memref<1x1x256xf32, #tpu.memory_space<vmem>>, vector<1x1x256xf32>,
    %c0_46 = arith.constant 0 : index
    %c0_47 = arith.constant 0 : index
    %c0_48 = arith.constant 0 : index
    %145 = vector.load %arg7[%c0_46, %c0_47, %c0_48] : memref<1x1x256xf32, #tpu.memory_space<vmem>>, vector<1x1x256xf32>
    %cst_49 = arith.constant dense<0.000000e+00> : vector<256xf32>
    %146 = vector.multi_reduction <add>, %76, %cst_49 [0] : vector<8x256xf32> to vector<256xf32>
    %147 = vector.shape_cast %146 : vector<256xf32> to vector<1x256xf32>
    %148 = vector.shape_cast %147 : vector<1x256xf32> to vector<1x1x256xf32>
    %149 = arith.addf %145, %148 : vector<1x1x256xf32>
    %c0_50 = arith.constant 0 : index
    %c0_51 = arith.constant 0 : index
    %c0_52 = arith.constant 0 : index
    %150 = vector.load %arg7[%c0_50, %c0_51, %c0_52] : memref<1x1x256xf32, #tpu.memory_space<vmem>>, vector<1x1x256xf32>
    tpu.vector_store %arg7[%c0_50, %c0_51, %c0_52], %149 {strides = array<i32>} : memref<1x1x256xf32, #tpu.memory_space<vmem>>, vector<1x1x256xf32>,
    return
  }
  func.func @transform_0(%arg0: i32, %arg1: i32) -> i32 {
    %c0_i32 = arith.constant 0 : i32
    %c0_i32_0 = arith.constant 0 : i32
    return %c0_i32 : i32
  }
  func.func @transform_1(%arg0: i32, %arg1: i32) -> (i32, i32, i32) {
    %c2_i32 = arith.constant 2 : i32
    %0 = arith.muli %arg0, %c2_i32 : i32
    %1 = arith.addi %0, %arg1 : i32
    %c0_i32 = arith.constant 0 : i32
    %c0_i32_0 = arith.constant 0 : i32
    %c0_i32_1 = arith.constant 0 : i32
    return %c0_i32, %1, %c0_i32_0 : i32, i32, i32
  }
  func.func @transform_2(%arg0: i32, %arg1: i32) -> (i32, i32, i32) {
    %c2_i32 = arith.constant 2 : i32
    %0 = arith.muli %arg0, %c2_i32 : i32
    %1 = arith.addi %0, %arg1 : i32
    %c0_i32 = arith.constant 0 : i32
    %c0_i32_0 = arith.constant 0 : i32
    %c0_i32_1 = arith.constant 0 : i32
    return %c0_i32, %1, %c0_i32_0 : i32, i32, i32
  }
  func.func @transform_3(%arg0: i32, %arg1: i32) -> (i32, i32) {
    %c0_i32 = arith.constant 0 : i32
    %c0_i32_0 = arith.constant 0 : i32
    %c0_i32_1 = arith.constant 0 : i32
    return %c0_i32, %c0_i32_0 : i32, i32
  }
  func.func @transform_4(%arg0: i32, %arg1: i32) -> (i32, i32, i32) {
    %c0_i32 = arith.constant 0 : i32
    %c0_i32_0 = arith.constant 0 : i32
    %c0_i32_1 = arith.constant 0 : i32
    return %arg0, %c0_i32, %c0_i32_0 : i32, i32, i32
  }
  func.func @transform_5(%arg0: i32, %arg1: i32) -> (i32, i32, i32) {
    %c0_i32 = arith.constant 0 : i32
    %c0_i32_0 = arith.constant 0 : i32
    %c0_i32_1 = arith.constant 0 : i32
    return %arg0, %c0_i32, %c0_i32_0 : i32, i32, i32
  }
}

</mosaic_0001>

<bundles_post_ra>
// kernel: tpu_custom_call.1
= control target key start
LH: loop header
LB: loop body
LE: loop exit
PB: predicated region body
PF: predicated region fallthrough
CT: control target
= control target key end

     0   :  { %s1797_s0 = inlined_call_operand.hbm [shape: f32[2], index: 0, kind: input, shape index: {}]   ;;  %s1798_s1 = inlined_call_operand.hbm [shape: f32[6,32,256], index: 1, kind: input, shape index: {}]   ;;  %s1799_s2 = inlined_call_operand.hbm [shape: f32[2,32,256], index: 2, kind: input, shape index: {}]   ;;  %s1800_s3 = inlined_call_operand.vmem [shape: f32[1,256], index: 3, kind: input, shape index: {}]   ;;  %s1801_s4 = inlined_call_operand.hbm [shape: f32[2,1,256], index: 4, kind: output, shape index: {0}]   ;;  %s1802_s5 = inlined_call_operand.hbm [shape: f32[2,1,256], index: 5, kind: output, shape index: {1}]  }
   0x1   :  { %1820 = sst [smem:[#allocation25_spill]] %s1797_s0 }
   0x2   :  { %1821 = sst [smem:[#allocation26_spill]] %s1798_s1 }
   0x3   :  { %1822 = sst [smem:[#allocation27_spill]] %s1801_s4 }
   0x4   :  { %1823 = sst [smem:[#allocation28_spill]] %s1802_s5 }
   0x5   :  { %11 = vsyncpa [#allocation5], 0 }
   0x6   :  { %12 = vsyncpa [#allocation3], 0 }
   0x7   :  { %14 = vsyncpa [#allocation3 + $0x1], 0 }
   0x8   :  { %15 = vsyncpa [#allocation8], 0 }
   0x9   :  { %17 = vsyncpa [#allocation8 + $0x1], 0 }
   0xa   :  { %18 = vsyncpa [#allocation4], 0 }
   0xb   :  { %20 = vsyncpa [#allocation4 + $0x1], 0 }
   0xc   :  { %21 = vsyncpa [#allocation11], 0 }
   0xd   :  { %23 = vsyncpa [#allocation11 + $0x1], 0  ;;  %s1318_s18 = smov 0   ;;  %s1320_s19 = smov 0  }
   0xe   :  { %s1322_s20 = smov 0   ;;  %s1324_s21 = smov 0  }
   0xf   :  { %s1326_s22 = smov 0   ;;  %s1328_s23 = smov 0  }
  0x10   :  { %s1330_s24 = smov 0   ;;  %s1332_s25 = smov 0  }
  0x11   :  { %s1334_s26 = smov 0   ;;  %s1336_s27 = smov 0  }
  0x12   :  { %s1338_s28 = smov 0  }
  0x13 LB: > { %1824 = sst [smem:[#allocation17_spill]] %s1236_s18  ;;  %s816_s29 = sadd.s32 4294967295, %s1276_s28   ;;  %s1276_s28 = sphi %s1338_s28, %s29_s28   ;;  %s1272_s27 = sphi %s1336_s27, %s1869_s27   ;;  %s1268_s26 = sphi %s1334_s26, %s1860_s26   ;;  %s1264_s25 = sphi %s1332_s25, %s1868_s25   ;;  %s1260_s24 = sphi %s1330_s24, %s1859_s24   ;;  %s1256_s23 = sphi %s1328_s23, %s1867_s23   ;;  %s1252_s22 = sphi %s1326_s22, %s1866_s22   ;;  %s1248_s21 = sphi %s1324_s21, %s1865_s21   ;;  %s1244_s20 = sphi %s1322_s20, %s1864_s20   ;;  %s1240_s19 = sphi %s1320_s19, %s1863_s19   ;;  %s1236_s18 = sphi %s1318_s18, %s1862_s18  }
  0x14   : > { %1825 = sst [smem:[#allocation18_spill]] %s1264_s25  ;;  %s817_s30 = sadd.s32 4294967294, %s1276_s28  }
  0x15   : > { %1826 = sst [smem:[#allocation19_spill]] %s1268_s26  ;;  %p80_p0 = scmp.ne.s32.totalorder %s1256_s23, %s1252_s22 }
  0x16   : > { %1827 = sst [smem:[#allocation20_spill]] %s1276_s28  ;;  %p81_p1 = scmp.eq.s32.totalorder %s1276_s28, 0 }
  0x17   : > { %p86_p2 = scmp.ne.s32.totalorder %s1252_s22, %s1248_s21  ;;  %p1378_p3 = scmp.eq.s32.totalorder %s816_s29, 0 }
  0x18   : > { %p1383_p4 = por %p81_p1, %p80_p0  ;;  %p160_p5 = scmp.ne.s32.totalorder %s1244_s20, %s1240_s19 }
  0x19   : > { %s1828_s7 = scalar_select %p1378_p3, 1, 0 }
  0x1a   : > { %p1391_p6 = por %p1378_p3, %p86_p2  ;;  %p161_p7 = scmp.eq.s32.totalorder %s816_s29, 3 }
  0x1b   : > { %p166_p8 = scmp.ne.s32.totalorder %s1240_s19, %s1236_s18  ;;  %p167_p9 = scmp.eq.s32.totalorder %s817_s30, 3 }
  0x1c   : > { %s1830_s10 = scalar_select %p1391_p6, 1, 0 }
  0x1d   : > { %p1397_p10 = por %p161_p7, %p160_p5  ;;  %p822_p11 = scmp.ge.s32.totalorder %s1276_s28, 1 }
  0x1e   : > { %p1402_p12 = por %p167_p9, %p166_p8  ;;  %p200_p13 = scmp.lt.s32.totalorder %s1276_s28, 5 }
  0x1f   : > { %s1831_s11 = scalar_select %p1397_p10, 1, 0 }
  0x20   : > { %s1833_s12 = scalar_select %p1402_p12, 1, 0 }
  0x21   : > { %1832 = sst [smem:[#allocation21_spill]] %s1831_s11  ;;  %p1407_p0 = pnand %p822_p11, %p200_p13 }
  0x22   : > { %1834 = sst [smem:[#allocation22_spill]] %s1833_s12  ;;  %p896_p1 = scmp.lt.s32.totalorder %s1276_s28, 4 }
  0x23   : > { %p877_p2 = pneg %p1407_p0  ;;  %s38_s15 = sadd.s32 1, %s1268_s26 }
  0x24   : > { %p1416_p6 = pnand %p896_p1, %p1383_p4  ;;  %p1423_p7 = scmp.ge.s32.totalorder %s38_s15, 2 }
  0x25   : > { %p878_p5 = pnand %p877_p2, %p1378_p3  ;;  %s1838_s0 = sld [smem:[#allocation25_spill]] }
  0x27   : > { %p1043_p9 = pneg %p878_p5 }
  0x2b   : > { %s1041_s29 = scalar_lea.hbm %s1838_s0, 16 }
  0x2c   : > { %p1042_p8 = scmp.ne.s32.totalorder %s1838_s0, %s1041_s29  ;;  %p1048_p13 = scmp.lt.u32.totalorder %s1041_s29, %s1838_s0 }
  0x2e   : > { %p1044_p4 = pnand %p1043_p9, %p1042_p8 }
  0x30   : > { %p1045_p11 = pneg %p1044_p4 }
  0x32   : > { %p1050_p1 = pnand %p1048_p13, %p1045_p11 }
  0x34   : > { %1053 = shalt.err (!%p1050_p1)
}
  0x35   : > { %s1278_s12 = smov [#allocation2]   ;;  %s1871_s15 = smov (%p1423_p7, %s38_s15), 0 }
  0x36   : > { %880 = dma.hbm_to_smem (!%p878_p5), %s1838_s0, 16, %s1278_s12, [#allocation5]  }
  0x37   : > { %1839 = sst [smem:[#allocation23_spill]] %s1871_s15  ;;  %s41_s6 = sadd.s32 1, %s1272_s27 }
  0x38   : > { %s818_s8 = sshll.u32 %s1272_s27, 1  ;;  %s1873_s6 = smov (!%p1423_p7, %s41_s6), %s1272_s27 }
  0x39   : > { %s1449_s17 = sadd.s32 %s1268_s26, %s818_s8  ;;  %s1452_s18 = sand.u32 1, %s1256_s23  }
  0x3a   : > { %p43_p2 = scmp.ge.s32.totalorder %s1873_s6, 2  ;;  %s863_s28 = smul.u32 96, %s1452_s18 }
  0x3b   : > { %s1810_s12 = sshll.u32 %s1449_s17, 8  ;;  %s1841_s1 = sld [smem:[#allocation26_spill]] }
  0x3c   : > { %s1875_s6 = smov (%p43_p2, %s1873_s6), 0  ;;  %s229_s26 = scalar_lea.vmem [#allocation6], %s863_s28 }
  0x3d   : > { %1840 = sst [smem:[#allocation24_spill]] %s1875_s6  ;;  %s819_s30 = sshll.u32 %s1875_s6, 1 }
  0x3e   : > { %s147_s9 = ssub.s32 %s1272_s27, %s1875_s6  ;;  %s69_s8 = sadd.s32 %s819_s30, %s1871_s15 }
  0x3f   : > { %p148_p5 = scmp.eq.s32.totalorder %s147_s9, 0  ;;  %s70_s0 = ssub.s32 %s1449_s17, %s69_s8 }
  0x40   : > { %s238_s4 = sshll.u32 %s229_s26, 4  ;;  %p71_p7 = scmp.eq.s32.totalorder %s70_s0, 0  ;;  %s1470_s4 = int_to_ptr.vmem [resolvable:$true] %s238_s4 }
  0x41   : > { %s1463_s29 = scalar_lea.hbm %s1841_s1, %s1810_s12  ;;  %s1842_s16 = sadd.s32 1, %s1244_s20 }
  0x42   : > { %s1475_s21 = scalar_select %p148_p5, %s1244_s20, %s1842_s16  }
  0x43   : > { %s1843_s12 = sadd.s32 1, %s1256_s23  ;;  %s226_s11 = scalar_lea.sflag [#allocation3], %s1452_s18 }
  0x44   : > { %s1480_s5 = scalar_select %p71_p7, %s1256_s23, %s1843_s12  }
  0x45   : > { %s1054_s25 = scalar_lea.hbm %s1463_s29, 1536  ;;  %p1056_p9 = pneg %p1416_p6 }
  0x46   : > { %p1055_p8 = scmp.ne.s32.totalorder %s1463_s29, %s1054_s25  ;;  %s1059_s0 = scalar_lea.hbm %s1841_s1, 6144 }
  0x47   : > { %p1060_p13 = scmp.lt.u32.totalorder %s1463_s29, %s1841_s1  ;;  %p1061_p1 = scmp.lt.u32.totalorder %s1059_s0, %s1054_s25 }
  0x48   : > { %p1057_p4 = pnand %p1056_p9, %p1055_p8  ;;  %p1063_p5 = scmp.lt.u32.totalorder %s1054_s25, %s1463_s29 }
  0x49   : > { %p1062_p2 = por %p1061_p1, %p1060_p13 }
  0x4a   : > { %p1058_p11 = pneg %p1057_p4 }
  0x4b   : > { %p1064_p7 = por %p1063_p5, %p1062_p2 }
  0x4d   : > { %p1065_p12 = pnand %p1064_p7, %p1058_p11 }
  0x4f   : > { %1068 = shalt.err (!%p1065_p12)
}
  0x50   : > { %s1069_s12 = scalar_lea.vmem %s1470_s4, 1536  ;;  %s1279_s8 = smov [#allocation6]  }
  0x51   : > { %p1070_p8 = scmp.ne.s32.totalorder %s1470_s4, %s1069_s12  ;;  %s1074_s16 = sshll.u32 %s1279_s8, 4  ;;  %s1075_s16 = int_to_ptr.vmem [resolvable:$false] %s1074_s16 }
  0x52   : > { %s1076_s28 = scalar_lea.vmem %s1075_s16, 3072  ;;  %p1077_p3 = scmp.lt.s32.totalorder %s1470_s4, %s1075_s16 }
  0x53   : > { %p1072_p4 = pnand %p1070_p8, %p1056_p9  ;;  %p1078_p13 = scmp.lt.s32.totalorder %s1076_s28, %s1069_s12 }
  0x55   : > { %p1073_p10 = pneg %p1072_p4  ;;  %p1079_p1 = por %p1078_p13, %p1077_p3 }
  0x57   : > { %p1080_p2 = pnand %p1079_p1, %p1073_p10 }
  0x59   : > { %1083 = shalt.err (!%p1080_p2)
}
  0x5a   : > { %s1280_s25 = smov 1024   ;;  %s1281_s26 = smov 256  }
  0x5b   : > { %s1282_s0 = smov 16   ;;  %s828_s30 = sshll.u32 %s1452_s18, 5 }
  0x5c   : > { %884 = dma.hbm_to_vmem [thread:$0]  (!%p1416_p6), %s1463_s29, 1536, %s1470_s4, %s226_s11, %s1280_s25, %s1281_s26, %s1282_s0  }
  0x5d   : > { %s1844_s9 = sshll.u32 %s1449_s17, 8  ;;  %s252_s28 = scalar_lea.vmem [#allocation7], %s828_s30 }
  0x5e   : > { %s1519_s16 = scalar_lea.hbm %s1799_s2, %s1844_s9  ;;  %s261_s1 = sshll.u32 %s252_s28, 4  ;;  %s1521_s1 = int_to_ptr.vmem [resolvable:$true] %s261_s1 }
  0x5f   : > { %s249_s6 = scalar_lea.sflag [#allocation8], %s1452_s18  ;;  %s1084_s15 = scalar_lea.hbm %s1519_s16, 512 }
  0x60   : > { %p1085_p3 = scmp.ne.s32.totalorder %s1519_s16, %s1084_s15  ;;  %s1089_s17 = scalar_lea.hbm %s1799_s2, 2048 }
  0x61   : > { %p1090_p11 = scmp.lt.u32.totalorder %s1519_s16, %s1799_s2  ;;  %p1091_p5 = scmp.lt.u32.totalorder %s1089_s17, %s1084_s15 }
  0x62   : > { %p1087_p10 = pnand %p1085_p3, %p1056_p9  ;;  %p1093_p8 = scmp.lt.u32.totalorder %s1084_s15, %s1519_s16 }
  0x63   : > { %p1092_p7 = por %p1091_p5, %p1090_p11 }
  0x64   : > { %p1088_p12 = pneg %p1087_p10 }
  0x65   : > { %p1094_p4 = por %p1093_p8, %p1092_p7 }
  0x67   : > { %p1095_p13 = pnand %p1094_p4, %p1088_p12 }
  0x69   : > { %1098 = shalt.err (!%p1095_p13)
}
  0x6a   : > { %s1099_s30 = scalar_lea.vmem %s1521_s1, 512  ;;  %s1283_s12 = smov [#allocation7]  }
  0x6b   : > { %p1100_p1 = scmp.ne.s32.totalorder %s1521_s1, %s1099_s30  ;;  %s1104_s8 = sshll.u32 %s1283_s12, 4  ;;  %s1105_s8 = int_to_ptr.vmem [resolvable:$false] %s1104_s8 }
  0x6c   : > { %s1106_s28 = scalar_lea.vmem %s1105_s8, 1024  ;;  %p1107_p10 = scmp.lt.s32.totalorder %s1521_s1, %s1105_s8 }
  0x6d   : > { %p1102_p2 = pnand %p1100_p1, %p1056_p9  ;;  %p1108_p11 = scmp.lt.s32.totalorder %s1106_s28, %s1099_s30 }
  0x6f   : > { %p1103_p3 = pneg %p1102_p2  ;;  %p1109_p5 = por %p1108_p11, %p1107_p10 }
  0x71   : > { %p1110_p7 = pnand %p1109_p5, %p1103_p3 }
  0x73   : > { %1113 = shalt.err (!%p1110_p7)
}
  0x74   : > { %887 = dma.hbm_to_vmem [thread:$0]  (!%p1416_p6), %s1519_s16, 512, %s1521_s1, %s249_s6, %s1280_s25, %s1281_s26, %s1282_s0  }
  0x75   : > { %273 = sbr.rel (%p1407_p0) target bundleno = 527 (0x20f), region = 36  ;;  %p1845_p9 = scmp.ne.s32.totalorder (!%p1407_p0), %s1828_s7, 0 }
  0x7c   : > { %1215 = dma.done.wait (%p1845_p9), [#allocation5], 16  }
  0x7d   : > { %1217 = vsyncadd (%p1845_p9), [#allocation5], 4294967280  ;;  %s279_s14 = sand.u32 1, %s1252_s22   ;;  %p1846_p12 = scmp.ne.s32.totalorder %s1830_s10, 0 }
  0x7e   : > { %s864_s15 = smul.u32 96, %s279_s14  ;;  %s280_s4 = scalar_lea.sflag [#allocation3], %s279_s14 }
  0x80   : > { %s1559_s11 = scalar_lea.vmem [#allocation6], %s864_s15 }
  0x81   : > { %1219 = dma.done.wait (%p1846_p12), %s280_s4, 1536  }
  0x82   : > { %1221 = vsyncadd (%p1846_p12), %s280_s4, 4294965760  ;;  %s834_s1 = sshll.u32 %s279_s14, 5  ;;  %s289_s13 = scalar_lea.sflag [#allocation8], %s279_s14 }
  0x83   : > { %s1565_s6 = scalar_lea.vmem [#allocation7], %s834_s1 }
  0x84   : > { %1223 = dma.done.wait (%p1846_p12), %s289_s13, 512  }
  0x85   : > { %1225 = vsyncadd (%p1846_p12), %s289_s13, 4294966784 }
  0x86   : > { %297 = sfence }
  0x87   : > { %s1572_s7 = sand.u32 1, %s1240_s19   ;;  %p837_p6 = scmp.ne.s32.totalorder %s1260_s24, 0 }
  0x88   : > { %s835_s18 = sshll.u32 %s1572_s7, 1  ;;  %v338_v0 = vlaneseq (!%p837_p6)  ;;  %v1284_v1 = vmov (!%p837_p6), 0.0  }
  0x89   : > { %s1575_s25 = scalar_lea.vmem [#allocation9], %s835_s18  ;;  %s1577_s26 = scalar_lea.vmem [#allocation10], %s835_s18 }
  0x8a   : > { %337 = sbr.rel (%p837_p6) target bundleno = 145 (0x91), region = 52  ;;  %vm340_vm0 = vcmp.lt.s32.totalorder (!%p837_p6), %v338_v0, 256 }
  0x8b   : > { %342 = vst.msk [vmem:[%s1575_s25] sm:$0x3] (!%p837_p6), %vm340_vm0, %v1284_v1  ;;  %343 = vst.msk [vmem:[%s1577_s26] sm:$0x3] (!%p837_p6), %vm340_vm0, %v1284_v1 }
  0x91 PF: > { %s344_s10 = sld [smem:[#allocation2]]  ;;  %v350_v2 = vlaneseq  ;;  %v380_v3 = vld [vmem:[%s1559_s11] sm:$0xff]  ;;  %v381_v4 = vld [vmem:[%s1559_s11 + $0x8] sm:$0xff]  ;;  %v841_v8 = vld [vmem:[%s1559_s11 + $0x10] sm:$0xff]  ;;  %s1590_s24 = sld [smem:[#allocation2 + $0x1]] }
  0x92   : > { %v843_v6 = vld [vmem:[%s1559_s11 + $0x20] sm:$0xff]  ;;  %v844_v7 = vld [vmem:[%s1559_s11 + $0x28] sm:$0xff]  ;;  %v842_v9 = vld [vmem:[%s1559_s11 + $0x18] sm:$0xff]  ;;  %s1847_s17 = sld [smem:[#allocation18_spill]]  ;;  %s1848_s29 = sld [smem:[#allocation21_spill]] }
  0x93   : > { %v1585_v5 = vshrl.u32 %v350_v2, 7  ;;  %v845_v10 = vld [vmem:[%s1559_s11 + $0x30] sm:$0xff]  ;;  %v346_v11 = vld [vmem:[%s1800_s3] sm:$0x3]  ;;  %v347_v15 = vld [vmem:[%s1565_s6] sm:$0xff]  ;;  %vm1671_vm1 = vcmp.lt.s32.totalorder %v350_v2, 256 }
  0x94   : > { %v846_v14 = vld [vmem:[%s1559_s11 + $0x38] sm:$0xff]  ;;  %v839_v16 = vld [vmem:[%s1565_s6 + $0x10] sm:$0xff]  ;;  %v847_v18 = vld [vmem:[%s1559_s11 + $0x40] sm:$0xff]  ;;  %s1851_s8 = sld [smem:[#allocation28_spill]]  ;;  %s664_s14 = sshll.u32 %s1577_s26, 4  ;;  %s665_s14 = int_to_ptr.vmem [resolvable:$true] %s664_s14 }
  0x95   : > { %v352_v12 = vsub.s32 0, %v1585_v5  ;;  %v356_v13 = vsub.s32 1, %v1585_v5  ;;  %v1603_v21 = vadd.f32 %v839_v16, %v347_v15  ;;  %v848_v26 = vld [vmem:[%s1559_s11 + $0x48] sm:$0xff]  ;;  %v849_v27 = vld [vmem:[%s1559_s11 + $0x50] sm:$0xff]  ;;  %v850_v28 = vld [vmem:[%s1559_s11 + $0x58] sm:$0xff]  ;;  %s636_s15 = scalar_lea.sflag [#allocation11], %s1572_s7 }
  0x96   : > { %v348_v33 = vld [vmem:[%s1565_s6 + $0x8] sm:$0xff]  ;;  %v840_v37 = vld [vmem:[%s1565_s6 + $0x18] sm:$0xff]  ;;  %s1114_s4 = scalar_lea.vmem %s665_s14, 32  ;;  %s1286_s11 = smov [#allocation10]  }
  0x97   : > { %v382_v17 = vstv %s344_s10  ;;  %v353_v19 = vrot.slane %v346_v11, %v352_v12  ;;  %v357_v20 = vrot.slane %v346_v11, %v356_v13  ;;  %v362_v45 = vstv %s1590_s24  ;;  %p1115_p0 = scmp.ne.s32.totalorder %s665_s14, %s1114_s4  ;;  %s1118_s1 = sshll.u32 %s1286_s11, 4  ;;  %s1119_s1 = int_to_ptr.vmem [resolvable:$false] %s1118_s1 }
  0x98   : > { %v383_v22 = vmul.f32 %v382_v17, %v380_v3  ;;  %v384_v23 = vmul.f32 %v382_v17, %v381_v4  ;;  %v467_v24 = vmul.f32 %v843_v6, %v382_v17  ;;  %v468_v25 = vmul.f32 %v844_v7, %v382_v17  ;;  %s861_s9 = sshll.u32 %s1847_s17, 5  ;;  %p1852_p8 = scmp.ne.s32.totalorder %s1848_s29, 0 }
  0x99   : > { %v436_v29 = vmul.f32 %v841_v8, %v382_v17  ;;  %v437_v30 = vmul.f32 %v842_v9, %v382_v17  ;;  %v490_v31 = vmul.f32 %v845_v10, %v382_v17  ;;  %v491_v32 = vmul.f32 %v846_v14, %v382_v17  ;;  %s1120_s13 = scalar_lea.vmem %s1119_s1, 64  ;;  %p1121_p1 = scmp.lt.s32.totalorder %s665_s14, %s1119_s1 }
  0x9a   : > { %v385_v34 = vmax.f32 %v383_v22, %v384_v23  ;;  %v469_v35 = vmax.f32 %v467_v24, %v468_v25  ;;  %v513_v36 = vmul.f32 %v847_v18, %v382_v17  ;;  %v514_v39 = vmul.f32 %v848_v26, %v382_v17  ;;  %s1685_s28 = scalar_lea.hbm %s1851_s8, %s861_s9  ;;  %p1116_p4 = pnand %p1115_p0, %p1852_p8 }
  0x9b   : > { %v438_v38 = vmax.f32 %v436_v29, %v437_v30  ;;  %v536_v40 = vmul.f32 %v849_v27, %v382_v17  ;;  %v537_v41 = vmul.f32 %v850_v28, %v382_v17  ;;  %v492_v42 = vmax.f32 %v490_v31, %v491_v32  ;;  %p1122_p2 = scmp.lt.s32.totalorder %s1120_s13, %s1114_s4 }
  0x9c   : > { %386 = vmax.xlane.f32.xlu0 %v385_v34  ;;  %470 = vmax.xlane.f32.xlu1 %v469_v35  ;;  %v360_v43 = vsub.f32 %v347_v15, %v353_v19  ;;  %v361_v44 = vsub.f32 %v348_v33, %v357_v20  ;;  %v414_v46 = vsub.f32 %v839_v16, %v353_v19  ;;  %p1117_p13 = pneg %p1116_p4 }
  0x9d   : > { %v415_v47 = vsub.f32 %v840_v37, %v357_v20  ;;  %v1611_v48 = vadd.f32 %v840_v37, %v348_v33  ;;  %v515_v49 = vmax.f32 %v513_v36, %v514_v39  ;;  %v538_v50 = vmax.f32 %v536_v40, %v537_v41  ;;  %p1123_p3 = por %p1122_p2, %p1121_p1 }
  0x9e   : > { %v363_v51 = vmul.f32 %v362_v45, %v360_v43  ;;  %v364_v52 = vmul.f32 %v362_v45, %v361_v44  ;;  %v416_v53 = vmul.f32 %v414_v46, %v362_v45 }
  0x9f   : > { %v417_v54 = vmul.f32 %v415_v47, %v362_v45  ;;  %p1124_p10 = pnand %p1123_p3, %p1117_p13 }
  0xa0   : > { %439 = vmax.xlane.f32.xlu0 %v438_v38  ;;  %493 = vmax.xlane.f32.xlu1 %v492_v42  ;;  %v365_v55 = vmax.f32 %v363_v51, %v364_v52 }
  0xa1   : > { %v418_v56 = vmax.f32 %v416_v53, %v417_v54 }
  0xa4   : > { %516 = vmax.xlane.f32.xlu0 %v515_v49  ;;  %539 = vmax.xlane.f32.xlu1 %v538_v50 }
  0xa8   : > { %366 = vmax.xlane.f32.xlu0 %v365_v55  ;;  %419 = vmax.xlane.f32.xlu1 %v418_v56 }
 0x129   : > { %v387_v57 = vpop.xlane.xlu0 %386  ;;  %v471_v58 = vpop.xlane.xlu1 %470 }
 0x12a   : > { %v1613_v59 = vsub.f32 %v383_v22, %v387_v57  ;;  %v1615_v60 = vsub.f32 %v384_v23, %v387_v57  ;;  %v1617_v61 = vsub.f32 %v467_v24, %v471_v58  ;;  %v1619_v62 = vsub.f32 %v468_v25, %v471_v58 }
 0x12c   : > { %v390_v63 = vmul.f32 1.442695, %v1613_v59  ;;  %v392_v0 = vmul.f32 1.442695, %v1615_v60  ;;  %v474_v1 = vmul.f32 1.442695, %v1617_v61 }
 0x12d   : > { %v476_v3 = vmul.f32 1.442695, %v1619_v62  ;;  %v440_v4 = vpop.xlane.xlu0 %439  ;;  %v494_v6 = vpop.xlane.xlu1 %493 }
 0x12e   : > { %993 = vpow2.f32 %v390_v63  ;;  %v1625_v7 = vsub.f32 %v436_v29, %v440_v4  ;;  %v1627_v8 = vsub.f32 %v437_v30, %v440_v4  ;;  %v1629_v9 = vsub.f32 %v490_v31, %v494_v6 }
 0x12f   : > { %995 = vpow2.f32 %v392_v0  ;;  %v1631_v10 = vsub.f32 %v491_v32, %v494_v6 }
 0x130   : > { %997 = vpow2.f32 %v474_v1  ;;  %v443_v11 = vmul.f32 1.442695, %v1625_v7  ;;  %v445_v12 = vmul.f32 1.442695, %v1627_v8  ;;  %v497_v13 = vmul.f32 1.442695, %v1629_v9 }
 0x131   : > { %999 = vpow2.f32 %v476_v3  ;;  %v499_v14 = vmul.f32 1.442695, %v1631_v10  ;;  %v517_v15 = vpop.xlane.xlu0 %516  ;;  %v540_v16 = vpop.xlane.xlu1 %539  ;;  %v598_v1 = vrot.slane %v1603_v21, 4  ;;  %v604_v3 = vrot.slane %v1611_v48, 4 }
 0x132   : > { %1001 = vpow2.f32 %v443_v11  ;;  %v1637_v17 = vsub.f32 %v513_v36, %v517_v15  ;;  %v1639_v18 = vsub.f32 %v514_v39, %v517_v15  ;;  %v1641_v19 = vsub.f32 %v536_v40, %v540_v16 }
 0x133   : > { %1003 = vpow2.f32 %v445_v12  ;;  %v1643_v20 = vsub.f32 %v537_v41, %v540_v16  ;;  %v599_v4 = vadd.f32 %v598_v1, %v1603_v21  ;;  %v605_v6 = vadd.f32 %v604_v3, %v1611_v48 }
 0x134   : > { %1005 = vpow2.f32 %v497_v13  ;;  %v520_v22 = vmul.f32 1.442695, %v1637_v17  ;;  %v522_v23 = vmul.f32 1.442695, %v1639_v18  ;;  %v543_v24 = vmul.f32 1.442695, %v1641_v19 }
 0x135   : > { %1007 = vpow2.f32 %v499_v14  ;;  %v545_v25 = vmul.f32 1.442695, %v1643_v20  ;;  %v367_v26 = vpop.xlane.xlu0 %366  ;;  %v420_v27 = vpop.xlane.xlu1 %419  ;;  %v600_v11 = vrot.slane %v599_v4, 2  ;;  %v606_v12 = vrot.slane %v605_v6, 2 }
 0x136   : > { %1009 = vpow2.f32 %v520_v22  ;;  %v368_v28 = vsub.f32 %v363_v51, %v367_v26  ;;  %v369_v29 = vsub.f32 %v364_v52, %v367_v26  ;;  %v421_v30 = vsub.f32 %v416_v53, %v420_v27 }
 0x137   : > { %1011 = vpow2.f32 %v522_v23  ;;  %v422_v31 = vsub.f32 %v417_v54, %v420_v27  ;;  %v601_v13 = vadd.f32 %v600_v11, %v599_v4  ;;  %v607_v14 = vadd.f32 %v606_v12, %v605_v6 }
 0x138   : > { %v994_v32 = vpop.eup %993  ;;  %1013 = vpow2.f32 %v543_v24  ;;  %v370_v33 = vmul.f32 1.442695, %v368_v28  ;;  %v372_v34 = vmul.f32 1.442695, %v369_v29  ;;  %v423_v35 = vmul.f32 1.442695, %v421_v30 }
 0x139   : > { %v996_v36 = vpop.eup %995  ;;  %1015 = vpow2.f32 %v545_v25  ;;  %v425_v37 = vmul.f32 1.442695, %v422_v31  ;;  %v602_v15 = vrot.slane %v601_v13, 1  ;;  %v608_v16 = vrot.slane %v607_v14, 1  ;;  %v597_v30 = vld [vmem:[%s1577_s26] sm:$0x3] }
 0x13a   : > { %v998_v38 = vpop.eup %997  ;;  %1017 = vpow2.f32 %v370_v33  ;;  %v394_v39 = vadd.f32 %v996_v36, %v994_v32  ;;  %v1285_v24 = vmov 1966171168  }
 0x13b   : > { %v1000_v40 = vpop.eup %999  ;;  %1019 = vpow2.f32 %v372_v34  ;;  %v603_v22 = vadd.f32 %v602_v15, %v601_v13  ;;  %v609_v23 = vadd.f32 %v608_v16, %v607_v14  ;;  %v577_v25 = vunpack.c.l.s4 %v1285_v24 }
 0x13c   : > { %v1002_v41 = vpop.eup %1001  ;;  %1021 = vpow2.f32 %v423_v35  ;;  %395 = vadd.xlane.f32.xlu0 %v394_v39  ;;  %v478_v42 = vadd.f32 %v1000_v40, %v998_v38 }
 0x13d   : > { %v1004_v43 = vpop.eup %1003  ;;  %1023 = vpow2.f32 %v425_v37  ;;  %v578_v26 = vunpack.c.0.s8 %v577_v25  ;;  %v612_v48 = vcombine.low %v603_v22, %v609_v23 }
 0x13e   : > { %v1006_v44 = vpop.eup %1005  ;;  %v447_v45 = vadd.f32 %v1004_v43, %v1002_v41 }
 0x13f   : > { %v1008_v46 = vpop.eup %1007  ;;  %v1666_v21 = vsub.s32 %v578_v26, %v1585_v5 }
 0x140   : > { %v1010_v47 = vpop.eup %1009  ;;  %479 = vadd.xlane.f32.xlu0 %v478_v42  ;;  %448 = vadd.xlane.f32.xlu1 %v447_v45  ;;  %v501_v49 = vadd.f32 %v1008_v46, %v1006_v44 }
 0x141   : > { %v1012_v50 = vpop.eup %1011  ;;  %v619_v27 = vrot.slane %v612_v48, %v1666_v21 }
 0x142   : > { %v1014_v51 = vpop.eup %1013  ;;  %v524_v52 = vadd.f32 %v1012_v50, %v1010_v47 }
 0x143   : > { %v1016_v53 = vpop.eup %1015  ;;  %v626_v28 = vrot.slane %v619_v27, %v1666_v21 }
 0x144   : > { %v1649_v54 = vpop.eup %1017  ;;  %502 = vadd.xlane.f32.xlu1 %v501_v49  ;;  %525 = vadd.xlane.f32.xlu0 %v524_v52  ;;  %v547_v55 = vadd.f32 %v1016_v53, %v1014_v51 }
 0x145   : > { %v1651_v56 = vpop.eup %1019  ;;  %v628_v31 = vadd.f32 %v626_v28, %v597_v30 }
 0x146   : > { %v1653_v57 = vpop.eup %1021  ;;  %v374_v58 = vadd.f32 %v1651_v56, %v1649_v54 }
 0x147   : > { %v1657_v63 = vpop.eup %1023  ;;  %629 = vst.msk [vmem:[%s1577_s26] sm:$0x3] %vm1671_vm1, %v628_v31 }
 0x148   : > { %548 = vadd.xlane.f32.xlu1 %v547_v55  ;;  %375 = vadd.xlane.f32.xlu0 %v374_v58  ;;  %v427_v0 = vadd.f32 %v1657_v63, %v1653_v57 }
 0x14c   : > { %428 = vadd.xlane.f32.xlu1 %v427_v0 }
 0x14d   : > { %1127 = shalt.err (!%p1124_p10)
}
 0x14e   : > { %s1128_s6 = scalar_lea.hbm %s1685_s28, 32  ;;  %s1132_s10 = scalar_lea.hbm %s1851_s8, 64 }
 0x14f   : > { %p1129_p11 = scmp.ne.s32.totalorder %s1685_s28, %s1128_s6  ;;  %p1133_p9 = scmp.lt.u32.totalorder %s1685_s28, %s1851_s8 }
 0x150   : > { %p1134_p12 = scmp.lt.u32.totalorder %s1132_s10, %s1128_s6  ;;  %p1136_p0 = scmp.lt.u32.totalorder %s1128_s6, %s1685_s28 }
 0x151   : > { %p1130_p5 = pnand %p1129_p11, %p1852_p8 }
 0x152   : > { %p1135_p6 = por %p1134_p12, %p1133_p9 }
 0x153   : > { %p1131_p7 = pneg %p1130_p5 }
 0x154   : > { %p1137_p4 = por %p1136_p0, %p1135_p6 }
 0x156   : > { %p1138_p13 = pnand %p1137_p4, %p1131_p7 }
 0x158   : > { %1141 = shalt.err (!%p1138_p13)
}
 0x159   : > { %874 = dma.vmem_to_hbm [thread:$0]  (%p1852_p8), %s665_s14, 32, %s1685_s28, %s636_s15  }
 0x15a   : > { %s650_s16 = sshll.u32 %s1575_s25, 4  ;;  %s1853_s28 = sld [smem:[#allocation27_spill]]  ;;  %s1733_s16 = int_to_ptr.vmem [resolvable:$true] %s650_s16 }
 0x15b   : > { %s631_s4 = scalar_lea.sflag [#allocation4], %s1572_s7  ;;  %s1142_s11 = scalar_lea.vmem %s1733_s16, 32 }
 0x15c   : > { %p1143_p1 = scmp.ne.s32.totalorder %s1733_s16, %s1142_s11  ;;  %s1287_s17 = smov [#allocation9]  }
 0x15d   : > { %s1146_s1 = sshll.u32 %s1287_s17, 4  ;;  %s1147_s1 = int_to_ptr.vmem [resolvable:$false] %s1146_s1 }
 0x15e   : > { %p1144_p2 = pnand %p1143_p1, %p1852_p8  ;;  %s1148_s13 = scalar_lea.vmem %s1147_s1, 64 }
 0x15f   : > { %p1149_p10 = scmp.lt.s32.totalorder %s1733_s16, %s1147_s1  ;;  %p1150_p11 = scmp.lt.s32.totalorder %s1148_s13, %s1142_s11 }
 0x160   : > { %s1854_s14 = smov %s1853_s28  ;;  %s1731_s15 = scalar_lea.hbm %s1853_s28, %s861_s9 }
 0x161   : > { %p1145_p3 = pneg %p1144_p2  ;;  %p1151_p5 = por %p1150_p11, %p1149_p10 }
 0x163   : > { %p1152_p7 = pnand %p1151_p5, %p1145_p3 }
 0x1c9   : > { %v396_v2 = vpop.xlane.xlu0 %395 }
 0x1ca   : > { %1025 = vlog2.f32 %v396_v2 }
 0x1cd   : > { %v449_v5 = vpop.xlane.xlu1 %448  ;;  %v480_v32 = vpop.xlane.xlu0 %479 }
 0x1ce   : > { %1027 = vlog2.f32 %v449_v5 }
 0x1cf   : > { %1029 = vlog2.f32 %v480_v32 }
 0x1d1   : > { %v503_v33 = vpop.xlane.xlu1 %502  ;;  %v526_v34 = vpop.xlane.xlu0 %525 }
 0x1d2   : > { %1031 = vlog2.f32 %v503_v33 }
 0x1d3   : > { %1033 = vlog2.f32 %v526_v34 }
 0x1d4   : > { %v1026_v35 = vpop.eup %1025 }
 0x1d5   : > { %v549_v36 = vpop.xlane.xlu1 %548  ;;  %v376_v37 = vpop.xlane.xlu0 %375  ;;  %v398_v38 = vmul.f32 0.6931472, %v1026_v35 }
 0x1d6   : > { %1035 = vlog2.f32 %v549_v36 }
 0x1d7   : > { %1037 = vrcp.f32 %v376_v37  ;;  %v399_v44 = vsub.f32 %v1613_v59, %v398_v38  ;;  %v400_v45 = vsub.f32 %v1615_v60, %v398_v38 }
 0x1d8   : > { %v1028_v39 = vpop.eup %1027 }
 0x1d9   : > { %v1030_v40 = vpop.eup %1029  ;;  %v451_v41 = vmul.f32 0.6931472, %v1028_v39  ;;  %v429_v42 = vpop.xlane.xlu1 %428 }
 0x1da   : > { %v482_v43 = vmul.f32 0.6931472, %v1030_v40  ;;  %1039 = vrcp.f32 %v429_v42  ;;  %v560_v42 = vld [vmem:[%s1575_s25] sm:$0x3] }
 0x1db   : > { %v452_v46 = vsub.f32 %v1625_v7, %v451_v41  ;;  %v453_v47 = vsub.f32 %v1627_v8, %v451_v41 }
 0x1dc   : > { %v1032_v49 = vpop.eup %1031  ;;  %v483_v50 = vsub.f32 %v1617_v61, %v482_v43  ;;  %v484_v55 = vsub.f32 %v1619_v62, %v482_v43 }
 0x1dd   : > { %v1034_v51 = vpop.eup %1033  ;;  %v456_v52 = vadd.f32 %v452_v46, %v399_v44  ;;  %v457_v53 = vadd.f32 %v453_v47, %v400_v45  ;;  %v505_v58 = vmul.f32 0.6931472, %v1032_v49 }
 0x1de   : > { %v528_v0 = vmul.f32 0.6931472, %v1034_v51 }
 0x1df   : > { %v485_v1 = vadd.f32 %v483_v50, %v456_v52  ;;  %v486_v3 = vadd.f32 %v484_v55, %v457_v53  ;;  %v506_v59 = vsub.f32 %v1629_v9, %v505_v58  ;;  %v507_v60 = vsub.f32 %v1631_v10, %v505_v58 }
 0x1e0   : > { %v1036_v4 = vpop.eup %1035  ;;  %v529_v7 = vsub.f32 %v1637_v17, %v528_v0  ;;  %v530_v61 = vsub.f32 %v1639_v18, %v528_v0 }
 0x1e1   : > { %v1038_v8 = vpop.eup %1037  ;;  %v508_v6 = vadd.f32 %v506_v59, %v485_v1  ;;  %v509_v11 = vadd.f32 %v507_v60, %v486_v3  ;;  %v551_v12 = vmul.f32 0.6931472, %v1036_v4 }
 0x1e2   : > { %v378_v13 = vmul.f32 %v1038_v8, %v1649_v54  ;;  %v379_v62 = vmul.f32 %v1038_v8, %v1651_v56 }
 0x1e3   : > { %v531_v14 = vadd.f32 %v529_v7, %v508_v6  ;;  %v532_v15 = vadd.f32 %v530_v61, %v509_v11  ;;  %v552_v16 = vsub.f32 %v1641_v19, %v551_v12  ;;  %v553_v9 = vsub.f32 %v1643_v20, %v551_v12 }
 0x1e4   : > { %v1040_v10 = vpop.eup %1039  ;;  %v405_v25 = vmul.f32 %v399_v44, %v378_v13  ;;  %v406_v18 = vmul.f32 %v400_v45, %v379_v62 }
 0x1e5   : > { %v431_v22 = vmul.f32 %v1040_v10, %v1653_v57  ;;  %v432_v17 = vmul.f32 %v1040_v10, %v1657_v63  ;;  %v554_v23 = vadd.f32 %v552_v16, %v531_v14  ;;  %v555_v24 = vadd.f32 %v553_v9, %v532_v15 }
 0x1e7   : > { %v454_v26 = vadd.f32 %v431_v22, %v378_v13  ;;  %v455_v48 = vadd.f32 %v432_v17, %v379_v62  ;;  %v458_v54 = vmul.f32 %v452_v46, %v431_v22  ;;  %v459_v27 = vmul.f32 %v453_v47, %v432_v17 }
 0x1e9   : > { %v460_v56 = vadd.f32 %v458_v54, %v405_v25  ;;  %v461_v28 = vadd.f32 %v459_v27, %v406_v18  ;;  %v556_v30 = vmul.f32 %v554_v23, %v454_v26  ;;  %v557_v31 = vmul.f32 %v555_v24, %v455_v48 }
 0x1eb   : > { %v558_v19 = vsub.f32 %v460_v56, %v556_v30  ;;  %v559_v20 = vsub.f32 %v461_v28, %v557_v31 }
 0x1ed   : > { %v561_v2 = vrot.slane %v558_v19, 4  ;;  %v567_v57 = vrot.slane %v559_v20, 4 }
 0x1ef   : > { %v562_v5 = vadd.f32 %v561_v2, %v558_v19  ;;  %v568_v63 = vadd.f32 %v567_v57, %v559_v20 }
 0x1f1   : > { %v563_v32 = vrot.slane %v562_v5, 2  ;;  %v569_v33 = vrot.slane %v568_v63, 2 }
 0x1f3   : > { %v564_v34 = vadd.f32 %v563_v32, %v562_v5  ;;  %v570_v35 = vadd.f32 %v569_v33, %v568_v63 }
 0x1f5   : > { %v565_v36 = vrot.slane %v564_v34, 1  ;;  %v571_v37 = vrot.slane %v570_v35, 1 }
 0x1f7   : > { %v566_v38 = vadd.f32 %v565_v36, %v564_v34  ;;  %v572_v39 = vadd.f32 %v571_v37, %v570_v35 }
 0x1f9   : > { %v575_v40 = vcombine.low %v566_v38, %v572_v39 }
 0x1fb   : > { %v582_v41 = vrot.slane %v575_v40, %v1666_v21 }
 0x1fd   : > { %v589_v43 = vrot.slane %v582_v41, %v1666_v21 }
 0x1ff   : > { %v591_v44 = vadd.f32 %v589_v43, %v560_v42 }
 0x201   : > { %596 = vst.msk [vmem:[%s1575_s25] sm:$0x3] %vm1671_vm1, %v591_v44 }
 0x202   : > { %1155 = shalt.err (!%p1152_p7)
}
 0x203   : > { %s1156_s7 = scalar_lea.hbm %s1731_s15, 32  ;;  %s1160_s6 = scalar_lea.hbm %s1854_s14, 64 }
 0x204   : > { %p1157_p9 = scmp.ne.s32.totalorder %s1731_s15, %s1156_s7  ;;  %p1161_p0 = scmp.lt.u32.totalorder %s1731_s15, %s1854_s14 }
 0x205   : > { %p1162_p4 = scmp.lt.u32.totalorder %s1160_s6, %s1156_s7  ;;  %p1164_p1 = scmp.lt.u32.totalorder %s1156_s7, %s1731_s15 }
 0x206   : > { %p1158_p12 = pnand %p1157_p9, %p1852_p8 }
 0x207   : > { %p1163_p13 = por %p1162_p4, %p1161_p0 }
 0x208   : > { %p1159_p6 = pneg %p1158_p12 }
 0x209   : > { %p1165_p2 = por %p1164_p1, %p1163_p13 }
 0x20b   : > { %p1166_p3 = pnand %p1165_p2, %p1159_p6 }
 0x20d   : > { %1169 = shalt.err (!%p1166_p3)
}
 0x20e   : > { %873 = dma.vmem_to_hbm [thread:$0]  (%p1852_p8), %s1733_s16, 32, %s1731_s15, %s631_s4  }
 0x20f PF: > { %s1855_s10 = sld [smem:[#allocation20_spill]]  ;;  %s1856_s24 = sld [smem:[#allocation17_spill]] }
 0x210   : > { %s1857_s0 = sld [smem:[#allocation22_spill]] }
 0x215   : > { %p898_p10 = scmp.ge.s32.totalorder %s1855_s10, 2  ;;  %s676_s30 = sand.u32 1, %s1856_s24  }
 0x216   : > { %p1858_p11 = scmp.ne.s32.totalorder %s1857_s0, 0  ;;  %s677_s12 = scalar_lea.sflag [#allocation4], %s676_s30 }
 0x218   : > { %p889_p5 = pnand %p898_p10, %p1858_p11 }
 0x21a   : > { %1227 = dma.done.wait (!%p889_p5), %s677_s12, 32  }
 0x21b   : > { %1229 = vsyncadd (!%p889_p5), %s677_s12, 4294967264  ;;  %s686_s28 = scalar_lea.sflag [#allocation11], %s676_s30 }
 0x21c   : > { %1231 = dma.done.wait (!%p889_p5), %s686_s28, 32  }
 0x21d   : > { %1233 = vsyncadd (!%p889_p5), %s686_s28, 4294967264  ;;  %s29_s28 = sadd.s32 1, %s1855_s10   ;;  %s1859_s24 = sld [smem:[#allocation19_spill]] }
 0x21e   : > { %p26_p7 = scmp.ge.s32.totalorder %s29_s28, 6   ;;  %s1860_s26 = sld [smem:[#allocation23_spill]] }
 0x21f   : > { %s1861_s29 = sld [smem:[#allocation24_spill]]  ;;  %s1862_s18 = smov %s1240_s19 }
 0x220   : > { %s1863_s19 = smov %s1244_s20  ;;  %s1864_s20 = smov %s1475_s21 }
 0x221   : > { %s1865_s21 = smov %s1252_s22  ;;  %s1866_s22 = smov %s1256_s23 }
 0x222   : > { %s1867_s23 = smov %s1480_s5  ;;  %s1868_s25 = smov %s1272_s27 }
 0x223   :  { %28 = sbr.rel (!%p26_p7) target bundleno = 19 (0x13), region = 126 }
 0x225   : > { %s1869_s27 = smov %s1861_s29 }
 0x22a   :  { %691 = vsyncpa [#allocation3], 1 }
 0x22b   :  { %693 = vsyncpa [#allocation3 + $0x1], 1 }
 0x22c   :  { %694 = vsyncpa [#allocation8], 1 }
 0x22d   :  { %696 = vsyncpa [#allocation8 + $0x1], 1 }
 0x22e   :  { %697 = vsyncpa [#allocation4], 1 }
 0x22f   :  { %699 = vsyncpa [#allocation4 + $0x1], 1 }
 0x230   :  { %700 = vsyncpa [#allocation11], 1 }
 0x231   :  { %702 = vsyncpa [#allocation11 + $0x1], 1 }
 0x232   :  { %703 = vsyncpa [#allocation5], 1 }
 0x233   :  { %705 = vsyncpa [#allocation5 + $0x1], 1 }

</bundles_post_ra>
